<compile_context>
chip_gen: v5e
topology: v5e:2x2
jax: 0.10.0
libtpu: 0.0.40
codegen_flags: <defaults>
</compile_context>

<pallas_src>
import jax
import jax.numpy as jnp
from jax.experimental import pallas as pl
from jax.experimental.pallas import tpu as pltpu

S_DIM = 10
H_DIM = 25
BRANCHES = (1, 2, 3)
OFFSETS = (0, 1, 3)               # column offsets of each head in the packed output
NUM_BRANCHES = len(BRANCHES)

LANES = 128                       # lane width; every matrix is padded to 128 columns
ONES_COL = LANES - 1              # activation lane that carries the constant 1 (bias path)
BIAS_ROW = LANES - 1              # weight-block row that holds the bias (matches ONES_COL)
SLAB_ROWS = 3 * LANES             # [W1_blk | Wf_blk | Wh_blk] stacked -> 384 rows


def _round_up(n, m):
    return ((n + m - 1) // m) * m


# ----------------------------------------------------------------------------
# Kernel: 3 MXU matmuls, 2 ReLUs, 1 unmasked full-tile lane-dense store.
# Biases ride inside the matmuls via the ones-carry column, so there is no
# extra VALU work beyond the two ReLU maximums.
# ----------------------------------------------------------------------------
def dqn_ab_kernel(x_ref, p_ref, out_ref):
    x = x_ref[...]                                  # (tb,128) f32; col 127 == 1

    w1 = p_ref[0:LANES, :]                          # (128,128) shared layer (+b1 in row 127)
    wf = p_ref[LANES:2 * LANES, :]                  # (128,128) fused [W2|Wd0|Wd1|Wd2] (+biases)
    wh = p_ref[2 * LANES:3 * LANES, :]              # (128,128) block-diagonal heads (+bo)

    # f = ReLU(x @ W1 + b1); lane 127 stays exactly 1 (carry), lanes 25:127 stay 0
    f = jnp.maximum(jnp.dot(x, w1, preferred_element_type=jnp.float32), 0.0)
    # h = ReLU(f @ [W2|Wd0|Wd1|Wd2] + [b2|bd*]) = [s | d0 | d1 | d2 | 0... | 1]
    h = jnp.maximum(jnp.dot(f, wf, preferred_element_type=jnp.float32), 0.0)
    # packed heads: cols off_i:off_i+br_i = d_i @ Wod_i + s @ Wos_i + bo_i
    out_ref[...] = jnp.dot(h, wh, preferred_element_type=jnp.float32)


# ----------------------------------------------------------------------------
# Wrapper
# ----------------------------------------------------------------------------
def dqn_ab_forward(x, slab, tile_b=1024):
    """Runs the fused DQN_AB forward pass; returns a list of per-branch outputs."""
    B = x.shape[0]
    tb = min(tile_b, _round_up(B, 8))               # row tile (multiple of 8 sublanes)
    b_pad = _round_up(B, tb)

    # lane-dense, zero-padded input slab; lane 127 carries the constant 1 (bias path)
    xp = jnp.zeros((b_pad, LANES), jnp.float32)
    xp = xp.at[:B, :S_DIM].set(x.astype(jnp.float32))
    xp = xp.at[:, ONES_COL].set(1.0)

    packed = pl.pallas_call(
        dqn_ab_kernel,
        out_shape=jax.ShapeDtypeStruct((b_pad, LANES), jnp.float32),
        grid_spec=pltpu.PrefetchScalarGridSpec(
            num_scalar_prefetch=0,
            grid=(b_pad // tb,),
            in_specs=[
                pl.BlockSpec((tb, LANES), lambda i: (i, 0)),          # x rows (pipelined)
                pl.BlockSpec((SLAB_ROWS, LANES), lambda i: (0, 0)),   # param slab (resident)
            ],
            out_specs=pl.BlockSpec((tb, LANES), lambda i: (i, 0)),
        ),
        compiler_params=pltpu.CompilerParams(
            dimension_semantics=("parallel",)),
    )(xp, slab)

    return [packed[:B, o:o + b] for o, b in zip(OFFSETS, BRANCHES)]


# ----------------------------------------------------------------------------
# Parameter construction (PyTorch-Linear-style uniform init, natural layout)
# and one-time packing into the fused (384,128) slab with embedded biases.
# ----------------------------------------------------------------------------
def init_params(key):
    def linear(k, fan_in, fan_out):
        kw, kb = jax.random.split(k)
        bound = 1.0 / jnp.sqrt(fan_in)
        w = jax.random.uniform(kw, (fan_in, fan_out), jnp.float32, -bound, bound)
        b = jax.random.uniform(kb, (1, fan_out), jnp.float32, -bound, bound)
        return w, b

    keys = jax.random.split(key, 2 + 2 * NUM_BRANCHES)
    w1, b1 = linear(keys[0], S_DIM, H_DIM)                  # shared
    w2, b2 = linear(keys[1], H_DIM, H_DIM)                  # shared_state
    wd, bd, wo, bo = [], [], [], []
    for i in range(NUM_BRANCHES):
        wdi, bdi = linear(keys[2 + i], H_DIM, H_DIM)        # domains[i]
        woi, boi = linear(keys[2 + NUM_BRANCHES + i], 2 * H_DIM, BRANCHES[i])
        wd.append(wdi); bd.append(bdi); wo.append(woi); bo.append(boi)
    return {"w1": w1, "b1": b1, "w2": w2, "b2": b2,
            "wd": wd, "bd": bd, "wo": wo, "bo": bo}


def pack_params(p):
    """Pack all weights/biases into one zero-padded, tile-aligned (384,128) slab.

    Block 0 (rows   0:128): W1 (10x25) + b1 in row 127 + ones-carry at [127,127].
    Block 1 (rows 128:256): fused [W2 | Wd0 | Wd1 | Wd2] (25x100) + [b2|bd*] in
                            its row 127 + ones-carry at [127,127].
    Block 2 (rows 256:384): block-diagonal packed heads (s-part rows 0:25,
                            d_i-part rows 25*(i+1):25*(i+2)) + bo in its row 127.
    """
    slab = jnp.zeros((SLAB_ROWS, LANES), jnp.float32)

    # --- block 0: shared layer -------------------------------------------------
    slab = slab.at[0:S_DIM, 0:H_DIM].set(p["w1"])
    slab = slab.at[BIAS_ROW, 0:H_DIM].set(p["b1"][0])
    slab = slab.at[BIAS_ROW, ONES_COL].set(1.0)             # propagate the ones carry

    # --- block 1: fused hidden [W2 | Wd0 | Wd1 | Wd2] ---------------------------
    r = LANES
    slab = slab.at[r:r + H_DIM, 0:H_DIM].set(p["w2"])
    slab = slab.at[r + BIAS_ROW, 0:H_DIM].set(p["b2"][0])
    for i in range(NUM_BRANCHES):
        c0 = H_DIM * (i + 1)
        slab = slab.at[r:r + H_DIM, c0:c0 + H_DIM].set(p["wd"][i])
        slab = slab.at[r + BIAS_ROW, c0:c0 + H_DIM].set(p["bd"][i][0])
    slab = slab.at[r + BIAS_ROW, ONES_COL].set(1.0)          # propagate the ones carry

    # --- block 2: block-diagonal head -------------------------------------------
    # h cols 0:25 = s; h cols 25*(i+1):25*(i+2) = d_i; torch.cat order is [d, s].
    r = 2 * LANES
    for i in range(NUM_BRANCHES):
        off, sz = OFFSETS[i], BRANCHES[i]
        wo_i = p["wo"][i]                                    # (2*H_DIM, sz) = [d-part; s-part]
        slab = slab.at[r:r + H_DIM, off:off + sz].set(wo_i[H_DIM:, :])      # s part
        r0 = r + H_DIM * (i + 1)
        slab = slab.at[r0:r0 + H_DIM, off:off + sz].set(wo_i[:H_DIM, :])    # d part
        slab = slab.at[r + BIAS_ROW, off:off + sz].set(p["bo"][i][0])
    return slab


def reference_forward(x, p):
    """Pure-JAX reference replicating the PyTorch module semantics."""
    f = jax.nn.relu(x @ p["w1"] + p["b1"])
    s = jax.nn.relu(f @ p["w2"] + p["b2"])
    outs = []
    for i in range(NUM_BRANCHES):
        d = jax.nn.relu(f @ p["wd"][i] + p["bd"][i])
        cat = jnp.concatenate([d, s], axis=1)                # torch.cat([branch, s], dim=1)
        outs.append(cat @ p["wo"][i] + p["bo"][i])
    return outs


if __name__ == "__main__":
    key = jax.random.PRNGKey(0)
    k_params, k_x = jax.random.split(key)

    params = init_params(k_params)
    slab = pack_params(params)

    B = 8
    x = jax.random.normal(k_x, (B, S_DIM), dtype=jnp.float32)

    outs = dqn_ab_forward(x, slab)
    outs = jax.block_until_ready(outs)

    refs = reference_forward(x, params)
    for o, r, b in zip(outs, refs, BRANCHES):
        assert o.shape == (B, b), (o.shape, b)
        assert jnp.allclose(o, r, atol=1e-5, rtol=1e-5), "mismatch vs reference"

    print("KERNEL_OK")
</pallas_src>

<mosaic_0001>
module attributes {stable_mosaic.version = 11 : i64} {
  func.func @dqn_ab_kernel(%arg0: i32, %arg1: memref<8x128xf32, #tpu.memory_space<vmem>>, %arg2: memref<384x128xf32, #tpu.memory_space<vmem>>, %arg3: memref<8x128xf32, #tpu.memory_space<vmem>>) attributes {dimension_semantics = [#tpu.dimension_semantics<parallel>], iteration_bounds = array<i64: 1>, scalar_prefetch = 0 : i64, scratch_operands = 0 : i64, tpu.core_type = #tpu.core_type<tc>, window_params = [{transform_indices = @transform_0, window_bounds = array<i64: 8, 128>}, {pipeline_mode = #tpu.pipeline_mode<synchronous>, transform_indices = @transform_1, window_bounds = array<i64: 384, 128>}, {transform_indices = @transform_2, window_bounds = array<i64: 8, 128>}]} {
    %c0 = arith.constant 0 : index
    %c0_0 = arith.constant 0 : index
    %0 = vector.load %arg1[%c0, %c0_0] : memref<8x128xf32, #tpu.memory_space<vmem>>, vector<8x128xf32>
    %c0_1 = arith.constant 0 : index
    %c0_2 = arith.constant 0 : index
    %1 = vector.load %arg2[%c0_1, %c0_2] : memref<384x128xf32, #tpu.memory_space<vmem>>, vector<128x128xf32>
    %c128 = arith.constant 128 : index
    %c0_3 = arith.constant 0 : index
    %2 = vector.load %arg2[%c128, %c0_3] : memref<384x128xf32, #tpu.memory_space<vmem>>, vector<128x128xf32>
    %c256 = arith.constant 256 : index
    %c0_4 = arith.constant 0 : index
    %3 = vector.load %arg2[%c256, %c0_4] : memref<384x128xf32, #tpu.memory_space<vmem>>, vector<128x128xf32>
    %cst = arith.constant dense<0.000000e+00> : vector<8x128xf32>
    %4 = tpu.matmul %0, %1, %cst {dimension_numbers = #tpu.dot_dimension_numbers<[1], [0], [0], [1], [0, 0, 1, 1], [], []>} : vector<8x128xf32>, vector<128x128xf32>, vector<8x128xf32> -> vector<8x128xf32>
    %cst_5 = arith.constant 0.000000e+00 : f32
    %5 = vector.broadcast %cst_5 : f32 to vector<8x128xf32>
    %6 = arith.maximumf %4, %5 : vector<8x128xf32>
    %cst_6 = arith.constant dense<0.000000e+00> : vector<8x128xf32>
    %7 = tpu.matmul %6, %2, %cst_6 {dimension_numbers = #tpu.dot_dimension_numbers<[1], [0], [0], [1], [0, 0, 1, 1], [], []>} : vector<8x128xf32>, vector<128x128xf32>, vector<8x128xf32> -> vector<8x128xf32>
    %cst_7 = arith.constant 0.000000e+00 : f32
    %8 = vector.broadcast %cst_7 : f32 to vector<8x128xf32>
    %9 = arith.maximumf %7, %8 : vector<8x128xf32>
    %cst_8 = arith.constant dense<0.000000e+00> : vector<8x128xf32>
    %10 = tpu.matmul %9, %3, %cst_8 {dimension_numbers = #tpu.dot_dimension_numbers<[1], [0], [0], [1], [0, 0, 1, 1], [], []>} : vector<8x128xf32>, vector<128x128xf32>, vector<8x128xf32> -> vector<8x128xf32>
    %c0_9 = arith.constant 0 : index
    %c0_10 = arith.constant 0 : index
    %11 = vector.load %arg3[%c0_9, %c0_10] : memref<8x128xf32, #tpu.memory_space<vmem>>, vector<8x128xf32>
    tpu.vector_store %arg3[%c0_9, %c0_10], %10 {strides = array<i32>} : memref<8x128xf32, #tpu.memory_space<vmem>>, vector<8x128xf32>,
    return
  }
  func.func @transform_0(%arg0: i32) -> (i32, i32) {
    %c0_i32 = arith.constant 0 : i32
    %c0_i32_0 = arith.constant 0 : i32
    return %arg0, %c0_i32 : i32, i32
  }
  func.func @transform_1(%arg0: i32) -> (i32, i32) {
    %c0_i32 = arith.constant 0 : i32
    %c0_i32_0 = arith.constant 0 : i32
    %c0_i32_1 = arith.constant 0 : i32
    return %c0_i32, %c0_i32_0 : i32, i32
  }
  func.func @transform_2(%arg0: i32) -> (i32, i32) {
    %c0_i32 = arith.constant 0 : i32
    %c0_i32_0 = arith.constant 0 : i32
    return %arg0, %c0_i32 : i32, i32
  }
}

</mosaic_0001>

<bundles_post_ra>
// kernel: tpu_custom_call.1
= control target key start
LH: loop header
LB: loop body
LE: loop exit
PB: predicated region body
PF: predicated region fallthrough
CT: control target
= control target key end

     0   :  { %7 = vsyncpa [#allocation3], 0  ;;  %s284_s0 = inlined_call_operand.hbm [shape: f32[8,128], index: 0, kind: input, shape index: {}]   ;;  %s285_s1 = inlined_call_operand.hbm [shape: f32[384,128], index: 1, kind: input, shape index: {}]   ;;  %s286_s2 = inlined_call_operand.hbm [shape: f32[8,128], index: 2, kind: output, shape index: {}]  }
   0x1   :  { %8 = vsyncpa [#allocation6], 0 }
   0x2   :  { %9 = vsyncpa [#allocation4], 0  ;;  %s15_s11 = sshll.u32 %s284_s0, 4  ;;  %s255_s12 = smov [#allocation2]   ;;  %s16_s11 = int_to_ptr.hbm [resolvable:$true] %s15_s11 }
   0x3   :  { %s17_s13 = sshll.u32 %s255_s12, 4  ;;  %s25_s16 = sshll.u32 %s285_s1, 4  ;;  %s18_s13 = int_to_ptr.vmem [resolvable:$true] %s17_s13  ;;  %s26_s16 = int_to_ptr.hbm [resolvable:$true] %s25_s16 }
   0x4   :  { %20 = dma.hbm_to_vmem [thread:$0]  %s16_s11, 128, %s18_s13, [#allocation3]  }
   0x5   :  { %s256_s17 = smov [#allocation5]   ;;  %s257_s19 = smov 128  }
   0x6   :  { %s27_s18 = sshll.u32 %s256_s17, 4  ;;  %s258_s20 = smov 8   ;;  %s28_s18 = int_to_ptr.vmem [resolvable:$true] %s27_s18 }
   0x7   :  { %33 = dma.hbm_to_vmem [thread:$0]  %s26_s16, 6144, %s28_s18, [#allocation6], %s257_s19, %s257_s19, %s258_s20  }
   0x8   :  { %249 = dma.done.wait [#allocation3], 128  }
   0x9   :  { %250 = vsyncadd [#allocation3], 4294967168 }
   0xa   :  { %251 = dma.done.wait [#allocation6], 6144  }
   0xb   :  { %252 = vsyncadd [#allocation6], 4294961152  ;;  %v58_v0 = vld [vmem:[#allocation5 + $0x78] sm:$0xff]  ;;  %v57_v1 = vld [vmem:[#allocation5 + $0x70] sm:$0xff]  ;;  %s259_s0 = smov [#allocation7]   ;;  %s161_s23 = sshll.u32 %s286_s2, 4  ;;  %s162_s23 = int_to_ptr.hbm [resolvable:$true] %s161_s23 }
   0xc   :  { %91 = vmatpush.msra.mxu0 %v58_v0  ;;  %v56_v2 = vld [vmem:[#allocation5 + $0x68] sm:$0xff]  ;;  %v55_v3 = vld [vmem:[#allocation5 + $0x60] sm:$0xff]  ;;  %v74_v4 = vld [vmem:[#allocation5 + $0xf8] sm:$0xff]  ;;  %s159_s1 = sshll.u32 %s259_s0, 4  ;;  %s160_s1 = int_to_ptr.vmem [resolvable:$true] %s159_s1 }
   0xd   :  { %v54_v5 = vld [vmem:[#allocation5 + $0x58] sm:$0xff]  ;;  %112 = vmatpush.msra.mxu1 %v74_v4  ;;  %v73_v6 = vld [vmem:[#allocation5 + $0xf0] sm:$0xff]  ;;  %v72_v7 = vld [vmem:[#allocation5 + $0xe8] sm:$0xff] }
   0xe   :  { %92 = vmatpush.msra.mxu0 %v57_v1  ;;  %v53_v8 = vld [vmem:[#allocation5 + $0x50] sm:$0xff]  ;;  %v71_v9 = vld [vmem:[#allocation5 + $0xe0] sm:$0xff]  ;;  %v52_v10 = vld [vmem:[#allocation5 + $0x48] sm:$0xff] }
   0xf   :  { %113 = vmatpush.msra.mxu1 %v73_v6  ;;  %v70_v11 = vld [vmem:[#allocation5 + $0xd8] sm:$0xff]  ;;  %v51_v12 = vld [vmem:[#allocation5 + $0x40] sm:$0xff]  ;;  %v69_v13 = vld [vmem:[#allocation5 + $0xd0] sm:$0xff] }
  0x10   :  { %93 = vmatpush.msra.mxu0 %v56_v2  ;;  %v50_v14 = vld [vmem:[#allocation5 + $0x38] sm:$0xff]  ;;  %v68_v15 = vld [vmem:[#allocation5 + $0xc8] sm:$0xff]  ;;  %v49_v16 = vld [vmem:[#allocation5 + $0x30] sm:$0xff] }
  0x11   :  { %114 = vmatpush.msra.mxu1 %v72_v7  ;;  %v67_v17 = vld [vmem:[#allocation5 + $0xc0] sm:$0xff]  ;;  %v48_v18 = vld [vmem:[#allocation5 + $0x28] sm:$0xff]  ;;  %v66_v19 = vld [vmem:[#allocation5 + $0xb8] sm:$0xff] }
  0x12   :  { %94 = vmatpush.msra.mxu0 %v55_v3  ;;  %v47_v20 = vld [vmem:[#allocation5 + $0x20] sm:$0xff]  ;;  %v65_v21 = vld [vmem:[#allocation5 + $0xb0] sm:$0xff]  ;;  %v46_v22 = vld [vmem:[#allocation5 + $0x18] sm:$0xff] }
  0x13   :  { %115 = vmatpush.msra.mxu1 %v71_v9  ;;  %v64_v23 = vld [vmem:[#allocation5 + $0xa8] sm:$0xff]  ;;  %v45_v24 = vld [vmem:[#allocation5 + $0x10] sm:$0xff]  ;;  %v63_v25 = vld [vmem:[#allocation5 + $0xa0] sm:$0xff] }
  0x14   :  { %95 = vmatpush.msra.mxu0 %v54_v5  ;;  %v44_v26 = vld [vmem:[#allocation5 + $0x8] sm:$0xff]  ;;  %v62_v27 = vld [vmem:[#allocation5 + $0x98] sm:$0xff]  ;;  %v43_v28 = vld [vmem:[#allocation5] sm:$0xff] }
  0x15   :  { %116 = vmatpush.msra.mxu1 %v70_v11  ;;  %v42_v29 = vld [vmem:[#allocation2] sm:$0xff]  ;;  %v61_v30 = vld [vmem:[#allocation5 + $0x90] sm:$0xff]  ;;  %v60_v31 = vld [vmem:[#allocation5 + $0x88] sm:$0xff] }
  0x16   :  { %96 = vmatpush.msra.mxu0 %v53_v8  ;;  %v59_v32 = vld [vmem:[#allocation5 + $0x80] sm:$0xff]  ;;  %v90_v33 = vld [vmem:[#allocation5 + $0x178] sm:$0xff]  ;;  %v89_v34 = vld [vmem:[#allocation5 + $0x170] sm:$0xff] }
  0x17   :  { %117 = vmatpush.msra.mxu1 %v69_v13  ;;  %133 = vmatpush.msra.mxu2 %v90_v33  ;;  %v88_v35 = vld [vmem:[#allocation5 + $0x168] sm:$0xff]  ;;  %v87_v36 = vld [vmem:[#allocation5 + $0x160] sm:$0xff]  ;;  %v86_v37 = vld [vmem:[#allocation5 + $0x158] sm:$0xff] }
  0x18   :  { %97 = vmatpush.msra.mxu0 %v52_v10  ;;  %v85_v38 = vld [vmem:[#allocation5 + $0x150] sm:$0xff]  ;;  %v84_v39 = vld [vmem:[#allocation5 + $0x148] sm:$0xff]  ;;  %v83_v40 = vld [vmem:[#allocation5 + $0x140] sm:$0xff] }
  0x19   :  { %118 = vmatpush.msra.mxu1 %v68_v15  ;;  %134 = vmatpush.msra.mxu2 %v89_v34  ;;  %v82_v41 = vld [vmem:[#allocation5 + $0x138] sm:$0xff]  ;;  %v81_v42 = vld [vmem:[#allocation5 + $0x130] sm:$0xff]  ;;  %v80_v43 = vld [vmem:[#allocation5 + $0x128] sm:$0xff] }
  0x1a   :  { %98 = vmatpush.msra.mxu0 %v51_v12  ;;  %v79_v44 = vld [vmem:[#allocation5 + $0x120] sm:$0xff]  ;;  %v78_v45 = vld [vmem:[#allocation5 + $0x118] sm:$0xff]  ;;  %v77_v46 = vld [vmem:[#allocation5 + $0x110] sm:$0xff] }
  0x1b   :  { %119 = vmatpush.msra.mxu1 %v67_v17  ;;  %135 = vmatpush.msra.mxu2 %v88_v35  ;;  %v76_v49 = vld [vmem:[#allocation5 + $0x108] sm:$0xff]  ;;  %v75_v50 = vld [vmem:[#allocation5 + $0x100] sm:$0xff] }
  0x1c   :  { %99 = vmatpush.msra.mxu0 %v50_v14 }
  0x1d   :  { %120 = vmatpush.msra.mxu1 %v66_v19  ;;  %136 = vmatpush.msra.mxu2 %v87_v36 }
  0x1e   :  { %100 = vmatpush.msra.mxu0 %v49_v16 }
  0x1f   :  { %121 = vmatpush.msra.mxu1 %v65_v21  ;;  %137 = vmatpush.msra.mxu2 %v86_v37 }
  0x20   :  { %101 = vmatpush.msra.mxu0 %v48_v18 }
  0x21   :  { %122 = vmatpush.msra.mxu1 %v64_v23  ;;  %138 = vmatpush.msra.mxu2 %v85_v38 }
  0x22   :  { %102 = vmatpush.msra.mxu0 %v47_v20 }
  0x23   :  { %123 = vmatpush.msra.mxu1 %v63_v25  ;;  %139 = vmatpush.msra.mxu2 %v84_v39 }
  0x24   :  { %103 = vmatpush.msra.mxu0 %v46_v22 }
  0x25   :  { %124 = vmatpush.msra.mxu1 %v62_v27  ;;  %140 = vmatpush.msra.mxu2 %v83_v40 }
  0x26   :  { %104 = vmatpush.msra.mxu0 %v45_v24 }
  0x27   :  { %125 = vmatpush.msra.mxu1 %v61_v30  ;;  %141 = vmatpush.msra.mxu2 %v82_v41 }
  0x28   :  { %105 = vmatpush.msra.mxu0 %v44_v26 }
  0x29   :  { %126 = vmatpush.msra.mxu1 %v60_v31  ;;  %142 = vmatpush.msra.mxu2 %v81_v42 }
  0x2a   :  { %106 = vmatpush.msra.mxu0 %v43_v28 }
  0x2b   :  { %107 = vmatmul.f32.vlgmr.msra.gmra.mxu0 %v42_v29  ;;  %127 = vmatpush.msra.mxu1 %v59_v32 }
  0x2c   :  { %143 = vmatpush.msra.mxu2 %v80_v43 }
  0x2e   :  { %144 = vmatpush.msra.mxu2 %v79_v44 }
  0x30   :  { %145 = vmatpush.msra.mxu2 %v78_v45 }
  0x32   :  { %146 = vmatpush.msra.mxu2 %v77_v46 }
  0x34   :  { %147 = vmatpush.msra.mxu2 %v76_v49 }
  0x36   :  { %148 = vmatpush.msra.mxu2 %v75_v50 }
  0xa8   :  { %v108_v47 = vpop.f32.mrf.mxu0 }
  0xa9   :  { %v111_v48 = vmax.f32 %v108_v47, 0.0 }
  0xab   :  { %128 = vmatmul.f32.vlgmr.msra.gmra.mxu1 %v111_v48 }
 0x128   :  { %v129_v51 = vpop.f32.mrf.mxu1 }
 0x129   :  { %v132_v52 = vmax.f32 %v129_v51, 0.0 }
 0x12b   :  { %149 = vmatmul.f32.vlgmr.msra.gmra.mxu2 %v132_v52 }
 0x1ae   :  { %v150_v53 = vpop.f32.mrf.mxu2 }
 0x1af   :  { %153 = vst [vmem:[#allocation7] sm:$0xff] %v150_v53 }
 0x1b0   :  { %164 = dma.vmem_to_hbm [thread:$0]  %s160_s1, 128, %s162_s23, [#allocation4]  }
 0x1b1   :  { %253 = dma.done.wait [#allocation4], 128  }
 0x1b2   :  { %254 = vsyncadd [#allocation4], 4294967168 }
 0x1b3   :  { %169 = vsyncpa [#allocation3], 1 }
 0x1b4   :  { %170 = vsyncpa [#allocation6], 1 }
 0x1b5   :  { %171 = vsyncpa [#allocation4], 1 }

</bundles_post_ra>
